<compile_context>
chip_gen: v6e
topology: v6e:2x2x1
jax: 0.10.0
libtpu: 0.0.40
codegen_flags: <defaults>
</compile_context>

<pallas_src>
import functools

import jax
import jax.numpy as jnp
from jax import lax
from jax.experimental import pallas as pl
from jax.experimental.pallas import tpu as pltpu


def _chan_layer_norm_kernel(x_ref, g_ref, o_ref, *, eps, stable):
    # x_ref: (C, TILE_HW) block (batch dim squeezed), g_ref: (C, 1)
    x = x_ref[...].astype(jnp.float32)
    c = x.shape[0]
    inv_c = 1.0 / float(c)

    if stable:
        # torch: x = x / x.amax(dim=1, keepdim=True).detach()
        # Reciprocal of the (1, tile) row runs on the EUP (cheap); multiplying
        # the block avoids a full-block VPU divide and an extra f32 temp pass.
        amax = jnp.max(x, axis=0, keepdims=True)
        x = x * pl.reciprocal(amax)

    # One-pass mean / population variance, f32 accumulation.
    s = jnp.sum(x, axis=0, keepdims=True)            # (1, TILE_HW)
    sq = jnp.sum(x * x, axis=0, keepdims=True)       # (1, TILE_HW)
    mean = s * inv_c
    var = jnp.maximum(sq * inv_c - mean * mean, 0.0)  # clamp cancellation

    g = g_ref[...].astype(jnp.float32)               # (C, 1) -> lane broadcast
    y = (x - mean) * lax.rsqrt(var + eps) * g
    o_ref[...] = y.astype(o_ref.dtype)


def _pick_tile_hw(hw, c, *, budget_bytes=4 << 20, min_total_steps=8):
    """Multiple-of-128 lane tile: fits a ~4 MiB f32 block, keeps >= ~8 steps."""
    per_lane_bytes = c * 4  # kernel math is f32
    budget_tile = max(128, (budget_bytes // per_lane_bytes) // 128 * 128)
    # Keep enough grid steps for pipelining / megacore when the image is small.
    steps_cap = max(128, (hw // min_total_steps) // 128 * 128)
    tile = min(budget_tile, steps_cap)
    # Never larger than the (padded) spatial extent.
    tile = min(tile, pl.cdiv(hw, 128) * 128)
    return tile


def _scoped_vmem_limit_bytes():
    """~75% of physical VMEM (96 MiB on v5e/v6e, 48 MiB on v7x)."""
    phys = 64 << 20  # conservative default (v7x per-TensorCore VMEM)
    try:
        phys = int(pltpu.get_tpu_info().vmem_capacity_bytes)
    except Exception:
        pass
    return (phys * 3) // 4


def chan_layer_norm(x, g, *, eps=1e-05, fp16_eps=1e-03, stable=False):
    """ChanLayerNorm forward. x: (N, C, H, W), g: (1, C, 1, 1)."""
    n, c, h, w = x.shape
    hw = h * w
    # eps selection mirrors the PyTorch module: fp32 -> eps, otherwise fp16_eps.
    eps_val = eps if x.dtype == jnp.float32 else fp16_eps

    x2 = x.reshape(n, c, hw)          # lane-dense spatial axis
    g2 = g.reshape(c, 1)              # cheap lane broadcast inside the kernel

    tile = _pick_tile_hw(hw, c)
    grid = (n, pl.cdiv(hw, tile))     # ragged last block is masked by Pallas

    kernel = functools.partial(
        _chan_layer_norm_kernel, eps=float(eps_val), stable=stable
    )

    itemsize = jnp.dtype(x.dtype).itemsize
    cost = pl.CostEstimate(
        flops=int(7 * n * c * hw),
        transcendentals=int(n * hw),
        bytes_accessed=int(2 * n * c * hw * itemsize + c * jnp.dtype(g.dtype).itemsize),
    )

    out = pl.pallas_call(
        kernel,
        out_shape=jax.ShapeDtypeStruct((n, c, hw), x.dtype),
        grid_spec=pltpu.PrefetchScalarGridSpec(
            num_scalar_prefetch=0,
            grid=grid,
            in_specs=[
                # Batch dim squeezed out of the kernel ref; channel axis whole.
                pl.BlockSpec((None, c, tile), lambda i, j: (i, 0, j)),
                # Gain stays VMEM-resident (constant index map).
                pl.BlockSpec((c, 1), lambda i, j: (0, 0)),
            ],
            out_specs=pl.BlockSpec((None, c, tile), lambda i, j: (i, 0, j)),
        ),
        compiler_params=pltpu.CompilerParams(
            dimension_semantics=("parallel", "parallel"),
            vmem_limit_bytes=int(_scoped_vmem_limit_bytes()),
        ),
        cost_estimate=cost,
    )(x2, g2)

    return out.reshape(n, c, h, w)


def chan_layer_norm_ref(x, g, *, eps=1e-05, fp16_eps=1e-03, stable=False):
    """Pure-JAX reference matching the PyTorch forward."""
    eps_val = eps if x.dtype == jnp.float32 else fp16_eps
    xf = x.astype(jnp.float32)
    if stable:
        xf = xf / jnp.max(xf, axis=1, keepdims=True)
    mean = jnp.mean(xf, axis=1, keepdims=True)
    var = jnp.mean((xf - mean) ** 2, axis=1, keepdims=True)
    y = (xf - mean) * lax.rsqrt(var + eps_val) * g.astype(jnp.float32)
    return y.astype(x.dtype)


if __name__ == "__main__":
    key = jax.random.PRNGKey(0)
    N, C, H, W = 2, 4, 16, 16
    x = jax.random.normal(key, (N, C, H, W), dtype=jnp.float32)

    # Parameter init matches nn.Parameter(torch.ones(1, dim, 1, 1))
    g = jnp.ones((1, C, 1, 1), dtype=jnp.float32)

    out = chan_layer_norm(x, g, eps=1e-05, fp16_eps=1e-03, stable=False)
    out = jax.block_until_ready(out)

    ref = chan_layer_norm_ref(x, g, eps=1e-05, fp16_eps=1e-03, stable=False)
    assert out.shape == (N, C, H, W)
    assert out.dtype == x.dtype
    assert jnp.allclose(out, ref, atol=1e-5, rtol=1e-5)

    # stable=True with a non-128-multiple spatial extent (ragged single block).
    x2 = jnp.abs(jax.random.normal(jax.random.PRNGKey(1), (1, C, 5, 7))) + 0.5
    out2 = jax.block_until_ready(
        chan_layer_norm(x2, g, eps=1e-05, fp16_eps=1e-03, stable=True)
    )
    ref2 = chan_layer_norm_ref(x2, g, eps=1e-05, fp16_eps=1e-03, stable=True)
    assert jnp.allclose(out2, ref2, atol=1e-5, rtol=1e-5)

    # Multi-block ragged spatial extent (exercises cdiv tiling + masked tail).
    C3 = 8
    g3 = jnp.ones((1, C3, 1, 1), dtype=jnp.float32)
    x3 = jax.random.normal(jax.random.PRNGKey(2), (1, C3, 17, 19), dtype=jnp.float32)
    out3 = jax.block_until_ready(chan_layer_norm(x3, g3))
    ref3 = chan_layer_norm_ref(x3, g3)
    assert jnp.allclose(out3, ref3, atol=1e-5, rtol=1e-5)

    print("KERNEL_OK")
</pallas_src>

<mosaic_0001>
module attributes {stable_mosaic.version = 11 : i64} {
  func.func @_chan_layer_norm_kernel(%arg0: i32, %arg1: i32, %arg2: memref<1x4x128xf32, #tpu.memory_space<vmem>>, %arg3: memref<4x1xf32, #tpu.memory_space<vmem>>, %arg4: memref<1x4x128xf32, #tpu.memory_space<vmem>>) attributes {dimension_semantics = [#tpu.dimension_semantics<parallel>, #tpu.dimension_semantics<parallel>], iteration_bounds = array<i64: 2, 2>, scalar_prefetch = 0 : i64, scratch_operands = 0 : i64, tpu.core_type = #tpu.core_type<tc>, window_params = [{transform_indices = @transform_0, window_bounds = array<i64: 1, 4, 128>}, {pipeline_mode = #tpu.pipeline_mode<synchronous>, transform_indices = @transform_1, window_bounds = array<i64: 4, 1>}, {transform_indices = @transform_2, window_bounds = array<i64: 1, 4, 128>}]} {
    %c0 = arith.constant 0 : index
    %c0_0 = arith.constant 0 : index
    %c0_1 = arith.constant 0 : index
    %0 = vector.load %arg2[%c0, %c0_0, %c0_1] : memref<1x4x128xf32, #tpu.memory_space<vmem>>, vector<1x4x128xf32>
    %1 = vector.shape_cast %0 : vector<1x4x128xf32> to vector<4x128xf32>
    %cst = arith.constant dense<0.000000e+00> : vector<128xf32>
    %2 = vector.multi_reduction <add>, %1, %cst [0] : vector<4x128xf32> to vector<128xf32>
    %3 = vector.shape_cast %2 : vector<128xf32> to vector<1x128xf32>
    %4 = arith.mulf %1, %1 : vector<4x128xf32>
    %cst_2 = arith.constant dense<0.000000e+00> : vector<128xf32>
    %5 = vector.multi_reduction <add>, %4, %cst_2 [0] : vector<4x128xf32> to vector<128xf32>
    %6 = vector.shape_cast %5 : vector<128xf32> to vector<1x128xf32>
    %cst_3 = arith.constant 2.500000e-01 : f32
    %7 = vector.broadcast %cst_3 : f32 to vector<1x128xf32>
    %8 = arith.mulf %3, %7 : vector<1x128xf32>
    %cst_4 = arith.constant 2.500000e-01 : f32
    %9 = vector.broadcast %cst_4 : f32 to vector<1x128xf32>
    %10 = arith.mulf %6, %9 : vector<1x128xf32>
    %11 = arith.mulf %8, %8 : vector<1x128xf32>
    %12 = arith.subf %10, %11 : vector<1x128xf32>
    %cst_5 = arith.constant 0.000000e+00 : f32
    %13 = vector.broadcast %cst_5 : f32 to vector<1x128xf32>
    %14 = arith.maximumf %12, %13 : vector<1x128xf32>
    %c0_6 = arith.constant 0 : index
    %c0_7 = arith.constant 0 : index
    %15 = vector.load %arg3[%c0_6, %c0_7] : memref<4x1xf32, #tpu.memory_space<vmem>>, vector<4x1xf32>
    %16 = vector.broadcast %8 : vector<1x128xf32> to vector<4x128xf32>
    %17 = arith.subf %1, %16 : vector<4x128xf32>
    %cst_8 = arith.constant 9.99999974E-6 : f32
    %18 = vector.broadcast %cst_8 : f32 to vector<1x128xf32>
    %19 = arith.addf %14, %18 : vector<1x128xf32>
    %20 = math.rsqrt %19 : vector<1x128xf32>
    %21 = vector.broadcast %20 : vector<1x128xf32> to vector<4x128xf32>
    %22 = arith.mulf %17, %21 : vector<4x128xf32>
    %23 = vector.broadcast %15 : vector<4x1xf32> to vector<4x128xf32>
    %24 = arith.mulf %22, %23 : vector<4x128xf32>
    %c0_9 = arith.constant 0 : index
    %c0_10 = arith.constant 0 : index
    %c0_11 = arith.constant 0 : index
    %25 = vector.load %arg4[%c0_9, %c0_10, %c0_11] : memref<1x4x128xf32, #tpu.memory_space<vmem>>, vector<1x4x128xf32>
    %26 = vector.shape_cast %25 : vector<1x4x128xf32> to vector<4x128xf32>
    %27 = vector.shape_cast %24 : vector<4x128xf32> to vector<1x4x128xf32>
    tpu.vector_store %arg4[%c0_9, %c0_10, %c0_11], %27 {strides = array<i32>} : memref<1x4x128xf32, #tpu.memory_space<vmem>>, vector<1x4x128xf32>,
    return
  }
  func.func @transform_0(%arg0: i32, %arg1: i32) -> (i32, i32, i32) {
    %c0_i32 = arith.constant 0 : i32
    %c0_i32_0 = arith.constant 0 : i32
    return %arg0, %c0_i32, %arg1 : i32, i32, i32
  }
  func.func @transform_1(%arg0: i32, %arg1: i32) -> (i32, i32) {
    %c0_i32 = arith.constant 0 : i32
    %c0_i32_0 = arith.constant 0 : i32
    %c0_i32_1 = arith.constant 0 : i32
    return %c0_i32, %c0_i32_0 : i32, i32
  }
  func.func @transform_2(%arg0: i32, %arg1: i32) -> (i32, i32, i32) {
    %c0_i32 = arith.constant 0 : i32
    %c0_i32_0 = arith.constant 0 : i32
    return %arg0, %c0_i32, %arg1 : i32, i32, i32
  }
}

</mosaic_0001>

<bundles_post_ra>
// kernel: tpu_custom_call.1
= control target key start
LH: loop header
LB: loop body
LE: loop exit
PB: predicated region body
PF: predicated region fallthrough
CT: control target
= control target key end

     0   :  { %7 = vsyncpa [#allocation3], 0  ;;  %s716_s0 = inlined_call_operand.hbm [shape: f32[2,4,256], index: 0, kind: input, shape index: {}]   ;;  %s717_s1 = inlined_call_operand.vmem [shape: f32[4,1], index: 1, kind: input, shape index: {}]   ;;  %s718_s2 = inlined_call_operand.hbm [shape: f32[2,4,256], index: 2, kind: output, shape index: {}]  }
   0x1   :  { %9 = vsyncpa [#allocation3 + $0x1], 0 }
   0x2   :  { %10 = vsyncpa [#allocation4], 0 }
   0x3   :  { %12 = vsyncpa [#allocation4 + $0x1], 0  ;;  %s553_s9 = smov 0   ;;  %s555_s10 = smov 0  }
   0x4   :  { %s557_s11 = smov 0   ;;  %s559_s12 = smov 0  }
   0x5   :  { %s561_s13 = smov 0   ;;  %s563_s14 = smov 0  }
   0x6   :  { %s565_s15 = smov 0   ;;  %s567_s16 = smov 0  }
   0x7 LB: > { %s312_s17 = sadd.s32 4294967295, %s533_s16   ;;  %s313_s18 = sadd.s32 4294967294, %s533_s16   ;;  %s533_s16 = sphi %s567_s16, %s18_s16   ;;  %s529_s15 = sphi %s565_s15, %s731_s15   ;;  %s525_s14 = sphi %s563_s14, %s730_s14   ;;  %s521_s13 = sphi %s561_s13, %s729_s13   ;;  %s517_s12 = sphi %s559_s12, %s728_s12   ;;  %s513_s11 = sphi %s557_s11, %s727_s11   ;;  %s509_s10 = sphi %s555_s10, %s726_s10   ;;  %s505_s9 = sphi %s553_s9, %s725_s9  }
   0x8   : > { %s27_s19 = sadd.s32 1, %s525_s14  ;;  %s30_s20 = sadd.s32 1, %s529_s15 }
   0x9   : > { %p28_p0 = scmp.ge.s32.totalorder %s27_s19, 2  ;;  %s39_s21 = sadd.s32 1, %s513_s11 }
   0xa   : > { %p46_p1 = scmp.ne.s32.totalorder %s513_s11, %s509_s10  ;;  %p47_p2 = scmp.eq.s32.totalorder %s533_s16, 0 }
   0xb   : > { %s733_s19 = smov (%p28_p0, %s27_s19), 0  ;;  %s735_s20 = smov (!%p28_p0, %s30_s20), %s529_s15 }
   0xc   : > { %s35_s22 = ssub.s32 %s525_s14, %s733_s19  ;;  %p606_p3 = por %p47_p2, %p46_p1 }
   0xd   : > { %p32_p4 = scmp.ge.s32.totalorder %s735_s20, 2  ;;  %p52_p5 = scmp.ne.s32.totalorder %s509_s10, %s505_s9 }
   0xe   : > { %p53_p6 = scmp.eq.s32.totalorder %s312_s17, 0  ;;  %p99_p7 = scmp.eq.s32.totalorder %s312_s17, 3 }
   0xf   : > { %s737_s20 = smov (%p32_p4, %s735_s20), 0  ;;  %p105_p10 = scmp.eq.s32.totalorder %s313_s18, 3 }
  0x10   : > { %p614_p8 = por %p53_p6, %p52_p5  ;;  %p618_p9 = por %p99_p7, %p46_p1 }
  0x11   : > { %s34_s26 = ssub.s32 %s529_s15, %s737_s20  ;;  %p624_p12 = por %p105_p10, %p52_p5 }
  0x12   : > { %s36_s27 = sor.u32 %s35_s22, %s34_s26  ;;  %p339_p13 = scmp.lt.s32.totalorder %s533_s16, 4 }
  0x13   : > { %p37_p11 = scmp.eq.s32.totalorder %s36_s27, 0  ;;  %s128_s29 = sand.u32 1, %s513_s11  }
  0x14   : > { %s722_s28 = scalar_select %p624_p12, 1, 0 }
  0x15   : > { %s631_s30 = scalar_select %p37_p11, %s513_s11, %s39_s21  }
  0x16   : > { %s316_s3 = sshll.u32 %s128_s29, 2  ;;  %s317_s4 = sshll.u32 %s529_s15, 1 }
  0x17   : > { %s137_s5 = sadd.s32 %s525_s14, %s317_s4  ;;  %s132_s6 = scalar_lea.vmem [#allocation2], %s316_s3 }
  0x18   : > { %s141_s7 = sshll.u32 %s132_s6, 4  ;;  %s318_s8 = sshll.u32 %s137_s5, 6  ;;  %s142_s7 = int_to_ptr.vmem [resolvable:$true] %s141_s7 }
  0x19   : > { %s139_s22 = scalar_lea.hbm %s716_s0, %s318_s8  ;;  %p640_p0 = pnand %p339_p13, %p606_p3 }
  0x1a   : > { %p319_p1 = scmp.ge.s32.totalorder %s533_s16, 1  ;;  %p146_p2 = scmp.lt.s32.totalorder %s533_s16, 5 }
  0x1b   : > { %s129_s21 = scalar_lea.sflag [#allocation3], %s128_s29  ;;  %p411_p4 = pneg %p640_p0 }
  0x1c   : > { %s422_s27 = scalar_lea.vmem %s142_s7, 64  ;;  %s535_s3 = smov [#allocation2]  }
  0x1d   : > { %p423_p5 = scmp.ne.s32.totalorder %s142_s7, %s422_s27  ;;  %s427_s4 = sshll.u32 %s535_s3, 4  ;;  %s428_s4 = int_to_ptr.vmem [resolvable:$false] %s427_s4 }
  0x1e   : > { %s429_s5 = scalar_lea.vmem %s428_s4, 128  ;;  %p430_p10 = scmp.lt.s32.totalorder %s142_s7, %s428_s4 }
  0x1f   : > { %p425_p6 = pnand %p423_p5, %p411_p4  ;;  %p431_p11 = scmp.lt.s32.totalorder %s429_s5, %s422_s27 }
  0x21   : > { %p426_p7 = pneg %p425_p6  ;;  %p432_p3 = por %p431_p11, %p430_p10 }
  0x23   : > { %p433_p13 = pnand %p432_p3, %p426_p7 }
  0x25   : > { %436 = shalt.err (!%p433_p13)
}
  0x26   : > { %334 = dma.hbm_to_vmem [thread:$0]  (!%p640_p0), %s139_s22, 64, %s142_s7, %s129_s21  }
  0x27   : > { %p147_p12 = pnand %p319_p1, %p146_p2 }
  0x28   : > { %s655_s23 = sand.u32 (!%p147_p12), 1, %s509_s10  }
  0x29   : > { %150 = sbr.rel (%p147_p12) target bundleno = 188 (0xbc), region = 28  ;;  %s320_s29 = sshll.u32 (!%p147_p12), %s655_s23, 2 }
  0x2a   : > { %s153_s6 = scalar_lea.sflag (!%p147_p12), [#allocation3], %s655_s23  ;;  %s156_s8 = scalar_lea.vmem (!%p147_p12), [#allocation2], %s320_s29 }
  0x2e   : > { %496 = dma.done.wait (%p614_p8), %s153_s6, 64  }
  0x2f   : > { %498 = vsyncadd (%p614_p8), %s153_s6, 4294967232  ;;  %v536_v0 = vmov 0   ;;  %v199_v1 = vld [vmem:[%s717_s1] sm:$0xf]  ;;  %vm178_vm0 = vcmask 1043456   ;;  %s323_s24 = sshll.u32 %s521_s13, 1 }
  0x30   : > { %406 = vset.pattern.permute.xlu0 %v536_v0  ;;  %v177_v2 = vld [vmem:[%s156_s8] sm:$0xf]  ;;  %s223_s18 = sadd.s32 %s517_s12, %s323_s24  ;;  %s176_s26 = scalar_lea.vmem [#allocation5], %s320_s29 }
  0x31   : > { %206 = vperm.xlu0 %406, %v199_v1   ;;  %v179_v3 = vsel %vm178_vm0, %v177_v2, 0.0  ;;  %v186_v4 = vmul.f32 %v177_v2, %v177_v2  ;;  %s324_s22 = sshll.u32 %s223_s18, 6  ;;  %s227_s21 = sshll.u32 %s176_s26, 4  ;;  %s228_s21 = int_to_ptr.vmem [resolvable:$true] %s227_s21 }
  0x32   : > { %v180_v5 = vrot.slane %v179_v3, 4  ;;  %s225_s4 = scalar_lea.hbm %s718_s2, %s324_s22  ;;  %s212_s5 = scalar_lea.sflag [#allocation4], %s655_s23 }
  0x33   : > { %v187_v6 = vsel %vm178_vm0, %v186_v4, 0.0  ;;  %s437_s6 = scalar_lea.vmem %s228_s21, 64  ;;  %s537_s12 = smov [#allocation5]  }
  0x34   : > { %v181_v7 = vadd.f32 %v180_v5, %v179_v3  ;;  %v188_v8 = vrot.slane %v187_v6, 4  ;;  %p438_p8 = scmp.ne.s32.totalorder %s228_s21, %s437_s6  ;;  %s441_s13 = sshll.u32 %s537_s12, 4  ;;  %s442_s13 = int_to_ptr.vmem [resolvable:$false] %s441_s13 }
  0x35   : > { %s443_s8 = scalar_lea.vmem %s442_s13, 128  ;;  %p444_p1 = scmp.lt.s32.totalorder %s228_s21, %s442_s13 }
  0x36   : > { %v182_v9 = vrot.slane %v181_v7, 2  ;;  %v189_v10 = vadd.f32 %v188_v8, %v187_v6  ;;  %p439_p12 = pnand %p438_p8, %p618_p9  ;;  %p445_p2 = scmp.lt.s32.totalorder %s443_s8, %s437_s6 }
  0x38   : > { %v183_v11 = vadd.f32 %v182_v9, %v181_v7  ;;  %v190_v12 = vrot.slane %v189_v10, 2  ;;  %p440_p0 = pneg %p439_p12  ;;  %p446_p4 = por %p445_p2, %p444_p1 }
  0x3a   : > { %v184_v13 = vrot.slane %v183_v11, 1  ;;  %v191_v14 = vadd.f32 %v190_v12, %v189_v10  ;;  %p447_p5 = pnand %p446_p4, %p440_p0 }
  0x3c   : > { %v185_v15 = vadd.f32 %v184_v13, %v183_v11  ;;  %v192_v16 = vrot.slane %v191_v14, 1 }
  0x3e   : > { %v193_v17 = vadd.f32 %v192_v16, %v191_v14  ;;  %v194_v18 = vmul.f32 0.25, %v185_v15 }
  0x40   : > { %v195_v19 = vmul.f32 0.25, %v193_v17  ;;  %v196_v20 = vmul.f32 %v194_v18, %v194_v18  ;;  %v200_v24 = vsub.f32 %v177_v2, %v194_v18 }
  0x42   : > { %v197_v21 = vsub.f32 %v195_v19, %v196_v20 }
  0x44   : > { %v198_v22 = vmax.f32 %v197_v21, 0.0 }
  0x46   : > { %v201_v23 = vadd.f32 1e-05, %v198_v22 }
  0x48   : > { %407 = vrsqrt.f32 %v201_v23 }
  0x55   : > { %v408_v25 = vpop.eup %407 }
  0x56   : > { %v203_v26 = vmul.f32 %v408_v25, %v200_v24 }
  0xac   : > { %v207_v27 = vpop.permute.xlu0 %206 }
  0xad   : > { %v209_v28 = vmul.f32 %v207_v27, %v203_v26 }
  0xaf   : > { %210 = vst [vmem:[%s176_s26] sm:$0xf] %v209_v28 }
  0xb0   : > { %450 = shalt.err (!%p447_p5)
}
  0xb1   : > { %s451_s29 = scalar_lea.hbm %s225_s4, 64  ;;  %s455_s17 = scalar_lea.hbm %s718_s2, 256 }
  0xb2   : > { %p452_p6 = scmp.ne.s32.totalorder %s225_s4, %s451_s29  ;;  %p456_p11 = scmp.lt.s32.totalorder %s225_s4, %s718_s2 }
  0xb3   : > { %p457_p3 = scmp.lt.s32.totalorder %s455_s17, %s451_s29 }
  0xb4   : > { %p453_p7 = pnand %p452_p6, %p618_p9 }
  0xb5   : > { %p458_p13 = por %p457_p3, %p456_p11 }
  0xb6   : > { %p454_p10 = pneg %p453_p7 }
  0xb8   : > { %p459_p8 = pnand %p458_p13, %p454_p10 }
  0xba   : > { %462 = shalt.err (!%p459_p8)
}
  0xbb   : > { %329 = dma.vmem_to_hbm [thread:$0]  (%p618_p9), %s228_s21, 64, %s225_s4, %s212_s5  }
  0xbc PF: > { %p340_p12 = scmp.ge.s32.totalorder %s533_s16, 2  ;;  %s239_s22 = sand.u32 1, %s505_s9  }
  0xbd   : > { %p724_p0 = scmp.ne.s32.totalorder %s722_s28, 0  ;;  %s240_s26 = scalar_lea.sflag [#allocation4], %s239_s22 }
  0xbf   : > { %p336_p1 = pnand %p340_p12, %p724_p0 }
  0xc1   : > { %p337_p2 = pneg %p336_p1 }
  0xc3   : > { %500 = dma.done.wait (%p337_p2), %s240_s26, 64  }
  0xc4   : > { %502 = vsyncadd (%p337_p2), %s240_s26, 4294967232  ;;  %s18_s16 = sadd.s32 1, %s533_s16   ;;  %s725_s9 = smov %s509_s10 }
  0xc5   : > { %p15_p4 = scmp.ge.s32.totalorder %s18_s16, 6   ;;  %s726_s10 = smov %s513_s11 }
  0xc6   : > { %s727_s11 = smov %s631_s30  ;;  %s728_s12 = smov %s525_s14 }
  0xc7   : > { %s729_s13 = smov %s529_s15  ;;  %s730_s14 = smov %s733_s19 }
  0xc8   : > { %s731_s15 = smov %s737_s20  ;;  %17 = sbr.rel (!%p15_p4) target bundleno = 7 (0x7), region = 73 }
  0xcd   :  { %245 = vsyncpa [#allocation3], 1 }
  0xce   :  { %247 = vsyncpa [#allocation3 + $0x1], 1 }
  0xcf   :  { %248 = vsyncpa [#allocation4], 1 }
  0xd0   :  { %250 = vsyncpa [#allocation4 + $0x1], 1 }

</bundles_post_ra>
